<compile_context>
chip_gen: v5e
topology: v5e:2x2
jax: 0.10.0
libtpu: 0.0.40
codegen_flags: <defaults>
</compile_context>

<pallas_src>
import functools

import jax
import jax.numpy as jnp
from jax.experimental import pallas as pl
from jax.experimental.pallas import tpu as pltpu


def _round_up(x, m):
    return (x + m - 1) // m * m


def _pick_tb(batch):
    """Static batch-tile choice (runs at trace time on Python ints)."""
    bp = _round_up(batch, 16)          # bf16 sublane packing
    if bp <= 16:
        return bp                      # single tiny tile; nothing to shard
    if bp <= 512:
        # Two balanced tiles -> keeps both v7x TensorCores busy via the
        # "parallel" grid axis while staying MXU-row-filling where possible.
        return _round_up((bp + 1) // 2, 16)
    # Large batch: 256-row tiles fill the v6e/v7x MXU (2x128 on v5e) and give
    # >=2 tiles per TensorCore; per-tile VMEM (x + out, double-buffered) is tiny.
    return 256


def _mlp_kernel(x_ref, w1_ref, b1_ref, w2_ref, b2_ref, o_ref):
    # fc1: bf16 MXU operands, f32 accumulation; bias add + ReLU stay f32
    # (v5e VPU has no bf16 ALUs; f32 elementwise is fine on all generations).
    h = jnp.dot(x_ref[...], w1_ref[...], preferred_element_type=jnp.float32)
    h = jnp.maximum(h + b1_ref[...], 0.0)           # (tb, H) + (1, H) broadcast
    # dropout -> identity in eval mode
    # fc2: cast the f32 activation back to bf16 for the MXU, accumulate in f32.
    y = jnp.dot(h.astype(w2_ref.dtype), w2_ref[...],
                preferred_element_type=jnp.float32)
    y = jnp.maximum(y + b2_ref[...], 0.0)           # (tb, Cp) + (1, Cp) broadcast
    o_ref[...] = y.astype(o_ref.dtype)              # bf16, full-lane unmasked store


def prepare_params(w1, b1, w2, b2):
    """One-time (model-load) padding/casting of the weights.

    w1: (D, H), b1: (1, H), w2: (H, C), b2: (1, C)  (x @ W layout, i.e. transposed
    vs. PyTorch nn.Linear.weight). Only the output class dim C is padded to 128;
    D and H are left unpadded (full-extent blocks are legal and cheaper).
    """
    D, H = w1.shape
    C = w2.shape[1]
    assert b1.shape == (1, H) and w2.shape == (H, C) and b2.shape == (1, C)
    Cp = _round_up(C, 128)
    mm_dtype = jnp.bfloat16
    w1p = w1.astype(mm_dtype)                                           # (D, H)
    b1p = b1.astype(jnp.float32)                                        # (1, H)
    w2p = jnp.zeros((H, Cp), mm_dtype).at[:, :C].set(w2.astype(mm_dtype))
    b2p = jnp.zeros((1, Cp), jnp.float32).at[:, :C].set(b2.astype(jnp.float32))
    return w1p, b1p, w2p, b2p


@functools.partial(jax.jit, static_argnames=("num_classes", "return_padded"))
def regularized_nn_forward(x, w1p, b1p, w2p, b2p, *, num_classes,
                           return_padded=False):
    """x: (B, D) f32; pre-padded params from prepare_params().

    Returns (B, num_classes) f32, or the raw (Bp, Cp) bf16 padded buffer when
    return_padded=True (avoids the extra slice copy for downstream fused use).
    """
    B, D = x.shape
    H = w1p.shape[1]
    Cp = w2p.shape[1]
    assert w1p.shape == (D, H) and b1p.shape == (1, H)
    assert w2p.shape == (H, Cp) and b2p.shape == (1, Cp)
    assert num_classes <= Cp

    tb = _pick_tb(B)                     # static (depends only on shapes)
    n_tiles = pl.cdiv(B, tb)
    Bp = n_tiles * tb

    xb = x.astype(jnp.bfloat16)
    if Bp != B:
        xb = jnp.zeros((Bp, D), jnp.bfloat16).at[:B, :].set(xb)

    flops = 2 * Bp * (D * H + H * Cp)
    bytes_accessed = (
        Bp * D * 2                                   # bf16 x in
        + (w1p.size + w2p.size) * 2                  # bf16 weights
        + (b1p.size + b2p.size) * 4                  # f32 biases
        + Bp * Cp * 2                                # bf16 out
    )

    out_padded = pl.pallas_call(
        _mlp_kernel,
        out_shape=jax.ShapeDtypeStruct((Bp, Cp), jnp.bfloat16),
        grid=(n_tiles,),
        in_specs=[
            pl.BlockSpec((tb, D), lambda i: (i, 0)),   # x tile: streamed over batch
            pl.BlockSpec((D, H), lambda i: (0, 0)),    # W1: VMEM-resident
            pl.BlockSpec((1, H), lambda i: (0, 0)),    # b1: VMEM-resident
            pl.BlockSpec((H, Cp), lambda i: (0, 0)),   # W2: VMEM-resident
            pl.BlockSpec((1, Cp), lambda i: (0, 0)),   # b2: VMEM-resident
        ],
        out_specs=pl.BlockSpec((tb, Cp), lambda i: (i, 0)),
        compiler_params=pltpu.CompilerParams(
            dimension_semantics=("parallel",),         # megacore sharding on v7x
        ),
        cost_estimate=pl.CostEstimate(
            flops=flops, transcendentals=0, bytes_accessed=bytes_accessed),
    )(xb, w1p, b1p, w2p, b2p)

    if return_padded:
        return out_padded                              # (Bp, Cp) bf16, no extra copy
    return out_padded[:B, :num_classes].astype(jnp.float32)


def init_params(key, input_size, num_classes, num):
    """Deterministic synthetic init matching nn.Linear shapes (transposed)."""
    k1, k2, k3, k4 = jax.random.split(key, 4)
    lim1 = 1.0 / jnp.sqrt(input_size)
    lim2 = 1.0 / jnp.sqrt(num)
    w1 = jax.random.uniform(k1, (input_size, num), jnp.float32, -lim1, lim1)
    b1 = jax.random.uniform(k2, (1, num), jnp.float32, -lim1, lim1)
    w2 = jax.random.uniform(k3, (num, num_classes), jnp.float32, -lim2, lim2)
    b2 = jax.random.uniform(k4, (1, num_classes), jnp.float32, -lim2, lim2)
    return w1, b1, w2, b2


if __name__ == "__main__":
    # Small shapes consistent with the module: batch=64 (2 grid tiles of 32),
    # input_size=16, hidden num=32, num_classes=4.
    B, D, H, C = 64, 16, 32, 4
    key = jax.random.PRNGKey(0)
    kx, kp = jax.random.split(key)
    x = jax.random.normal(kx, (B, D), jnp.float32)
    w1, b1, w2, b2 = init_params(kp, input_size=D, num_classes=C, num=H)

    params = prepare_params(w1, b1, w2, b2)   # once, at "model load" time

    out = jax.block_until_ready(
        regularized_nn_forward(x, *params, num_classes=C))
    assert out.shape == (B, C) and out.dtype == jnp.float32

    # Padded fast path (no slice copy) must agree with the sliced result.
    out_pad = jax.block_until_ready(
        regularized_nn_forward(x, *params, num_classes=C, return_padded=True))
    assert out_pad.dtype == jnp.bfloat16 and out_pad.shape[1] % 128 == 0
    assert jnp.allclose(out_pad[:B, :C].astype(jnp.float32), out)

    # Pure-JAX reference mirroring the kernel's numerics:
    # bf16-rounded matmul operands, f32 accumulation, f32 bias/ReLU,
    # eval-mode dropout, bf16-rounded output.
    xb = x.astype(jnp.bfloat16).astype(jnp.float32)
    w1b = w1.astype(jnp.bfloat16).astype(jnp.float32)
    w2b = w2.astype(jnp.bfloat16).astype(jnp.float32)
    h_ref = jnp.maximum(xb @ w1b + b1, 0.0)
    h_ref = h_ref.astype(jnp.bfloat16).astype(jnp.float32)
    y_ref = jnp.maximum(h_ref @ w2b + b2, 0.0)
    ref = y_ref.astype(jnp.bfloat16).astype(jnp.float32)
    assert jnp.allclose(out, ref, atol=5e-3, rtol=5e-3), (
        float(jnp.max(jnp.abs(out - ref))))

    # Sanity vs. full-f32 math (loose tolerance due to bf16 rounding).
    ref_f32 = jnp.maximum(jnp.maximum(x @ w1 + b1, 0.0) @ w2 + b2, 0.0)
    assert jnp.allclose(out, ref_f32, atol=5e-2, rtol=5e-2)

    print("KERNEL_OK")
</pallas_src>

<mosaic_0001>
module attributes {stable_mosaic.version = 11 : i64} {
  func.func @_mlp_kernel(%arg0: i32, %arg1: memref<32x16xbf16, #tpu.memory_space<vmem>>, %arg2: memref<16x32xbf16, #tpu.memory_space<vmem>>, %arg3: memref<1x32xf32, #tpu.memory_space<vmem>>, %arg4: memref<32x128xbf16, #tpu.memory_space<vmem>>, %arg5: memref<1x128xf32, #tpu.memory_space<vmem>>, %arg6: memref<32x128xbf16, #tpu.memory_space<vmem>>) attributes {dimension_semantics = [#tpu.dimension_semantics<parallel>], iteration_bounds = array<i64: 2>, scalar_prefetch = 0 : i64, scratch_operands = 0 : i64, tpu.core_type = #tpu.core_type<tc>, window_params = [{transform_indices = @transform_0, window_bounds = array<i64: 32, 16>}, {pipeline_mode = #tpu.pipeline_mode<synchronous>, transform_indices = @transform_1, window_bounds = array<i64: 16, 32>}, {pipeline_mode = #tpu.pipeline_mode<synchronous>, transform_indices = @transform_2, window_bounds = array<i64: 1, 32>}, {pipeline_mode = #tpu.pipeline_mode<synchronous>, transform_indices = @transform_3, window_bounds = array<i64: 32, 128>}, {pipeline_mode = #tpu.pipeline_mode<synchronous>, transform_indices = @transform_4, window_bounds = array<i64: 1, 128>}, {transform_indices = @transform_5, window_bounds = array<i64: 32, 128>}]} {
    %c0 = arith.constant 0 : index
    %c0_0 = arith.constant 0 : index
    %0 = vector.load %arg1[%c0, %c0_0] : memref<32x16xbf16, #tpu.memory_space<vmem>>, vector<32x16xbf16>
    %c0_1 = arith.constant 0 : index
    %c0_2 = arith.constant 0 : index
    %1 = vector.load %arg2[%c0_1, %c0_2] : memref<16x32xbf16, #tpu.memory_space<vmem>>, vector<16x32xbf16>
    %cst = arith.constant dense<0.000000e+00> : vector<32x32xf32>
    %2 = tpu.matmul %0, %1, %cst {dimension_numbers = #tpu.dot_dimension_numbers<[1], [0], [0], [1], [0, 0, 1, 1], [], []>} : vector<32x16xbf16>, vector<16x32xbf16>, vector<32x32xf32> -> vector<32x32xf32>
    %c0_3 = arith.constant 0 : index
    %c0_4 = arith.constant 0 : index
    %3 = vector.load %arg3[%c0_3, %c0_4] : memref<1x32xf32, #tpu.memory_space<vmem>>, vector<1x32xf32>
    %4 = vector.broadcast %3 : vector<1x32xf32> to vector<32x32xf32>
    %5 = arith.addf %2, %4 : vector<32x32xf32>
    %cst_5 = arith.constant 0.000000e+00 : f32
    %6 = vector.broadcast %cst_5 : f32 to vector<32x32xf32>
    %7 = arith.maximumf %5, %6 : vector<32x32xf32>
    %8 = arith.truncf %7 : vector<32x32xf32> to vector<32x32xbf16>
    %c0_6 = arith.constant 0 : index
    %c0_7 = arith.constant 0 : index
    %9 = vector.load %arg4[%c0_6, %c0_7] : memref<32x128xbf16, #tpu.memory_space<vmem>>, vector<32x128xbf16>
    %cst_8 = arith.constant dense<0.000000e+00> : vector<32x128xf32>
    %10 = tpu.matmul %8, %9, %cst_8 {dimension_numbers = #tpu.dot_dimension_numbers<[1], [0], [0], [1], [0, 0, 1, 1], [], []>} : vector<32x32xbf16>, vector<32x128xbf16>, vector<32x128xf32> -> vector<32x128xf32>
    %c0_9 = arith.constant 0 : index
    %c0_10 = arith.constant 0 : index
    %11 = vector.load %arg5[%c0_9, %c0_10] : memref<1x128xf32, #tpu.memory_space<vmem>>, vector<1x128xf32>
    %12 = vector.broadcast %11 : vector<1x128xf32> to vector<32x128xf32>
    %13 = arith.addf %10, %12 : vector<32x128xf32>
    %cst_11 = arith.constant 0.000000e+00 : f32
    %14 = vector.broadcast %cst_11 : f32 to vector<32x128xf32>
    %15 = arith.maximumf %13, %14 : vector<32x128xf32>
    %16 = arith.truncf %15 : vector<32x128xf32> to vector<32x128xbf16>
    %c0_12 = arith.constant 0 : index
    %c0_13 = arith.constant 0 : index
    %17 = vector.load %arg6[%c0_12, %c0_13] : memref<32x128xbf16, #tpu.memory_space<vmem>>, vector<32x128xbf16>
    tpu.vector_store %arg6[%c0_12, %c0_13], %16 {strides = array<i32>} : memref<32x128xbf16, #tpu.memory_space<vmem>>, vector<32x128xbf16>,
    return
  }
  func.func @transform_0(%arg0: i32) -> (i32, i32) {
    %c0_i32 = arith.constant 0 : i32
    %c0_i32_0 = arith.constant 0 : i32
    return %arg0, %c0_i32 : i32, i32
  }
  func.func @transform_1(%arg0: i32) -> (i32, i32) {
    %c0_i32 = arith.constant 0 : i32
    %c0_i32_0 = arith.constant 0 : i32
    %c0_i32_1 = arith.constant 0 : i32
    return %c0_i32, %c0_i32_0 : i32, i32
  }
  func.func @transform_2(%arg0: i32) -> (i32, i32) {
    %c0_i32 = arith.constant 0 : i32
    %c0_i32_0 = arith.constant 0 : i32
    %c0_i32_1 = arith.constant 0 : i32
    return %c0_i32, %c0_i32_0 : i32, i32
  }
  func.func @transform_3(%arg0: i32) -> (i32, i32) {
    %c0_i32 = arith.constant 0 : i32
    %c0_i32_0 = arith.constant 0 : i32
    %c0_i32_1 = arith.constant 0 : i32
    return %c0_i32, %c0_i32_0 : i32, i32
  }
  func.func @transform_4(%arg0: i32) -> (i32, i32) {
    %c0_i32 = arith.constant 0 : i32
    %c0_i32_0 = arith.constant 0 : i32
    %c0_i32_1 = arith.constant 0 : i32
    return %c0_i32, %c0_i32_0 : i32, i32
  }
  func.func @transform_5(%arg0: i32) -> (i32, i32) {
    %c0_i32 = arith.constant 0 : i32
    %c0_i32_0 = arith.constant 0 : i32
    return %arg0, %c0_i32 : i32, i32
  }
}

</mosaic_0001>

<bundles_post_ra>
// kernel: regularized_nn_forward.1
= control target key start
LH: loop header
LB: loop body
LE: loop exit
PB: predicated region body
PF: predicated region fallthrough
CT: control target
= control target key end

     0   :  { %s503_s18 = smov 0   ;;  %s542_s0 = inlined_call_operand.vmem [shape: bf16[64,16], index: 0, kind: input, shape index: {}]   ;;  %s543_s1 = inlined_call_operand.vmem [shape: bf16[16,32], index: 1, kind: input, shape index: {}]   ;;  %s544_s2 = inlined_call_operand.vmem [shape: f32[1,32], index: 2, kind: input, shape index: {}]   ;;  %s545_s3 = inlined_call_operand.vmem [shape: bf16[32,128], index: 3, kind: input, shape index: {}]   ;;  %s546_s4 = inlined_call_operand.vmem [shape: f32[1,128], index: 4, kind: input, shape index: {}]   ;;  %s547_s5 = inlined_call_operand.vmem [shape: bf16[64,128], index: 5, kind: output, shape index: {}]  }
   0x1 LB: > { %s401_s19 = sadd.s32 4294967295, %s471_s18   ;;  %p405_p0 = scmp.ge.s32.totalorder %s471_s18, 1  ;;  %s471_s18 = sphi %s503_s18, %s15_s18  }
   0x2   : > { %p188_p1 = scmp.lt.s32.totalorder %s471_s18, 3 }
   0x4   : > { %p189_p2 = pnand %p405_p0, %p188_p1 }
   0x5   : > { %s406_s22 = sshll.u32 (!%p189_p2), %s401_s19, 2 }
   0x6   : > { %192 = sbr.rel (%p189_p2) target bundleno = 308 (0x134), region = 40  ;;  %p217_p3 = scmp.lt.s32.totalorder (!%p189_p2), %s406_s22, 7 }
   0xb   : > { %v438_v0 = vld [vmem:[%s543_s1] sm:$0xff]  ;;  %s549_s22 = smov (!%p217_p3, %s406_s22), 7  ;;  %vm255_vm0 = vcmask 130048   ;;  %v440_v3 = vld [vmem:[%s545_s3 + $0x8] sm:$0xff]  ;;  %vm307_vm1 = vcmask 261120  }
   0xc   : > { %269 = vmatpush.bf16.msra.mxu0 %v438_v0  ;;  %452 = vmatpush.bf16.msra.mxu3 %v438_v0  ;;  %s407_s23 = sshll.u32 %s549_s22, 2  ;;  %v439_v4 = vld [vmem:[%s545_s3] sm:$0xff] }
   0xd   : > { %s220_s26 = scalar_lea.vmem %s542_s0, %s407_s23  ;;  %320 = vmatpush.bf16.msra.mxu1 %v440_v3  ;;  %453 = vmatpush.bf16.msra.mxu2 %v440_v3  ;;  %v463_v6 = vld [vmem:[%s544_s2] ss:$0 sm:$0xff]  ;;  %s226_s12 = scalar_lea.vmem %s547_s5, %s407_s23 }
   0xe   : > { %v436_v1 = vld [vmem:[%s220_s26] sm:$0xff]  ;;  %v437_v2 = vld [vmem:[%s220_s26 + $0x8] sm:$0xff] }
   0xf   : > { %422 = vmatmul.msk.bf16.vlgmr.msra.gmra.mxu0 %vm255_vm0, %v436_v1  ;;  %423 = vmatmul.msk.bf16.vlgmr.msra.gmra.mxu3 %vm255_vm0, %v437_v2  ;;  %v464_v21 = vld [vmem:[%s546_s4] ss:$0 sm:$0xff] }
  0x11   : > { %321 = vmatpush.bf16.msra.mxu1 %v439_v4  ;;  %454 = vmatpush.bf16.msra.mxu2 %v439_v4 }
  0x8c   : > { %v271_v5 = vpop.f32.mrf.mxu0 }
  0x8d   : > { %v272_v7 = vadd.f32 %v463_v6, %v271_v5 }
  0x8f   : > { %v281_v10 = vmax.f32 %v272_v7, 0.0 }
  0x92   : > { %v276_v8 = vpop.f32.mrf.mxu3 }
  0x93   : > { %v277_v13 = vadd.f32 %v463_v6, %v276_v8 }
  0x94   : > { %v273_v9 = vpop.f32.mrf.mxu0 }
  0x95   : > { %v274_v11 = vadd.f32 %v463_v6, %v273_v9  ;;  %v283_v17 = vmax.f32 %v277_v13, 0.0 }
  0x97   : > { %v282_v12 = vmax.f32 %v274_v11, 0.0 }
  0x99   : > { %v285_v14 = vpack.c.bf16 %v282_v12, %v281_v10 }
  0x9a   : > { %v278_v15 = vpop.f32.mrf.mxu3 }
  0x9b   : > { %v279_v16 = vadd.f32 %v463_v6, %v278_v15  ;;  %432 = vmatmul.msk.bf16.vlgmr.msra.gmra.mxu1 %vm307_vm1, %v285_v14 }
  0x9d   : > { %v284_v18 = vmax.f32 %v279_v16, 0.0 }
  0x9f   : > { %v286_v19 = vpack.c.bf16 %v284_v18, %v283_v17 }
  0xa1   : > { %433 = vmatmul.msk.bf16.vlgmr.msra.gmra.mxu2 %vm307_vm1, %v286_v19 }
 0x118   : > { %v323_v20 = vpop.f32.mrf.mxu1 }
 0x119   : > { %v324_v22 = vadd.f32 %v464_v21, %v323_v20 }
 0x11b   : > { %v333_v25 = vmax.f32 %v324_v22, 0.0 }
 0x120   : > { %v325_v23 = vpop.f32.mrf.mxu1 }
 0x121   : > { %v326_v24 = vadd.f32 %v464_v21, %v325_v23 }
 0x123   : > { %v334_v26 = vmax.f32 %v326_v24, 0.0 }
 0x124   : > { %v328_v27 = vpop.f32.mrf.mxu2 }
 0x125   : > { %v444_v28 = vpack.c.bf16 %v334_v26, %v333_v25  ;;  %v329_v29 = vadd.f32 %v464_v21, %v328_v27 }
 0x127   : > { %445 = vst [vmem:[%s226_s12] sm:$0xff] %v444_v28   ;;  %v335_v32 = vmax.f32 %v329_v29, 0.0 }
 0x12c   : > { %v330_v30 = vpop.f32.mrf.mxu2 }
 0x12d   : > { %v331_v31 = vadd.f32 %v464_v21, %v330_v30 }
 0x12f   : > { %v336_v33 = vmax.f32 %v331_v31, 0.0 }
 0x131   : > { %v449_v34 = vpack.c.bf16 %v336_v33, %v335_v32 }
 0x133   : > { %451 = vst [vmem:[%s226_s12 + $0x8] sm:$0xff] %v449_v34  }
 0x134 PF: > { %s15_s18 = sadd.s32 1, %s471_s18  }
 0x135   : > { %p12_p4 = scmp.ge.s32.totalorder %s15_s18, 4  }
 0x137   :  { %14 = sbr.rel (!%p12_p4) target bundleno = 1 (0x1), region = 70 }

</bundles_post_ra>
